<compile_context>
chip_gen: v7x
topology: tpu7x:2x2x1
jax: 0.10.0
libtpu: 0.0.40
codegen_flags: <defaults>
</compile_context>

<pallas_src>
import functools

import jax
import jax.numpy as jnp
from jax import lax
from jax.experimental import pallas as pl
from jax.experimental.pallas import tpu as pltpu


def _sap_kernel(x_ref, w_ref, o_ref):
    """Full-T path: one block of batch rows per grid step (VPU/XLU/EUP only)."""
    x = x_ref[...].astype(jnp.float32)                 # (B, T, H)
    w = w_ref[...].astype(jnp.float32)                 # (1, H)

    # Attention logits: VPU multiply + lane(H) reduction.  Linear bias omitted
    # (softmax is shift-invariant, so the module output is unchanged).
    logits = jnp.sum(x * w, axis=-1)                   # (B, T)

    # Numerically stable softmax; fold the normalization into the weights.
    m = jnp.max(logits, axis=-1, keepdims=True)        # (B, 1)
    e = jnp.exp(logits - m)                            # (B, T)
    denom = jnp.sum(e, axis=-1, keepdims=True)         # (B, 1)
    p = e * pl.reciprocal(denom)                       # (B, T)

    # Weighted sum over T: VPU multiply + sublane(T) reduction (no M=1 MXU matmuls).
    out = jnp.sum(p[:, :, None] * x, axis=1)           # (B, H)
    o_ref[...] = out.astype(o_ref.dtype)


def _sap_online_kernel(x_ref, w_ref, o_ref, m_sc, l_sc, acc_sc, *,
                       t_blk, t_total, ragged_t):
    """T-tiled online-softmax path: grid = (batch blocks, T blocks), T innermost."""
    t = pl.program_id(1)

    @pl.when(t == 0)
    def _init():
        m_sc[...] = jnp.full_like(m_sc, -jnp.inf)
        l_sc[...] = jnp.zeros_like(l_sc)
        acc_sc[...] = jnp.zeros_like(acc_sc)

    x = x_ref[...].astype(jnp.float32)                 # (B, Tb, H)
    w = w_ref[...].astype(jnp.float32)                 # (1, H)

    if ragged_t:
        # Mask the padded tail of the last T block: zero x, -inf logits.
        col = lax.broadcasted_iota(jnp.int32, x.shape[:2], 1)        # (B, Tb)
        valid = (t * t_blk + col) < t_total
        x = jnp.where(valid[:, :, None], x, 0.0)
        logits = jnp.sum(x * w, axis=-1)
        logits = jnp.where(valid, logits, -jnp.inf)
    else:
        logits = jnp.sum(x * w, axis=-1)               # (B, Tb)

    m_prev = m_sc[...]                                 # (B, 1)
    m_new = jnp.maximum(m_prev, jnp.max(logits, axis=-1, keepdims=True))
    alpha = jnp.exp(m_prev - m_new)                    # (B, 1); exp(-inf) = 0 on block 0
    p = jnp.exp(logits - m_new)                        # (B, Tb)

    l_sc[...] = alpha * l_sc[...] + jnp.sum(p, axis=-1, keepdims=True)
    acc_sc[...] = alpha * acc_sc[...] + jnp.sum(p[:, :, None] * x, axis=1)
    m_sc[...] = m_new

    @pl.when(t == pl.num_programs(1) - 1)
    def _finalize():
        o_ref[...] = (acc_sc[...] * pl.reciprocal(l_sc[...])).astype(o_ref.dtype)


def _vmem_limit_bytes():
    # v5e/v6e: 128 MiB physical -> 64 MiB scoped; v7x: 64 MiB physical -> 32 MiB scoped.
    cap = 64 * 1024 * 1024
    try:
        info = pltpu.get_tpu_info()
        cap = int(getattr(info, "vmem_capacity_bytes", cap))
    except Exception:
        pass
    return max(16 * 1024 * 1024, min(cap // 2, 64 * 1024 * 1024))


def self_attention_pooling(batch_rep, w, b=None, *, max_block_bytes=None):
    """batch_rep: (N, T, H) f32/bf16; w: (H, 1) (nn.Linear(H,1).weight transposed).
    The bias b is ignored in-kernel (softmax(logits + b) == softmax(logits)).
    Returns (N, H) in batch_rep.dtype."""
    del b
    N, T, H = batch_rep.shape
    dtype = batch_rep.dtype
    itemsize = jnp.dtype(dtype).itemsize

    vmem_limit = _vmem_limit_bytes()
    # One x block; leave room for double-buffering + block-sized elementwise temporaries.
    per_buf = vmem_limit // 4 if max_block_bytes is None else int(max_block_bytes)

    w_row = jnp.reshape(w, (1, H)).astype(dtype)       # lane-dense weight row
    bytes_per_row = T * H * itemsize
    cost = pl.CostEstimate(
        flops=4 * N * T * H,
        transcendentals=N * T,
        bytes_accessed=itemsize * (N * T * H + N * H + H),
    )

    if bytes_per_row * min(N, 8) <= per_buf:
        # ---------------- full-T path ----------------
        b_blk = min(per_buf // bytes_per_row, 1024, N)
        # Keep >= 2 (>= 4) grid steps for v7x's two TensorCores when N is large enough.
        if N >= 32:
            b_blk = min(b_blk, max(8, (N // 4) // 8 * 8))
        elif N >= 16:
            b_blk = min(b_blk, max(8, (N // 2) // 8 * 8))
        if b_blk < N:
            b_blk = max(8, (b_blk // 8) * 8)           # (b_blk, H) out block: sublane x8
        grid = (pl.cdiv(N, b_blk),)
        return pl.pallas_call(
            _sap_kernel,
            out_shape=jax.ShapeDtypeStruct((N, H), dtype),
            grid_spec=pltpu.PrefetchScalarGridSpec(
                num_scalar_prefetch=0,
                grid=grid,
                in_specs=[
                    pl.BlockSpec((b_blk, T, H), lambda n: (n, 0, 0)),
                    pl.BlockSpec((1, H), lambda n: (0, 0)),
                ],
                out_specs=pl.BlockSpec((b_blk, H), lambda n: (n, 0)),
            ),
            compiler_params=pltpu.CompilerParams(
                dimension_semantics=("parallel",),
                vmem_limit_bytes=vmem_limit,
            ),
            cost_estimate=cost,
        )(batch_rep, w_row)

    # ---------------- T-tiled online-softmax path (long sequences) ----------------
    b_blk = min(N, 8)
    t_rows = per_buf // max(1, b_blk * H * itemsize)
    if t_rows >= T:
        t_blk = T
    else:
        t_blk = max(8, (t_rows // 8) * 8)
        t_blk = min(t_blk, T)
        if t_blk < T and T % t_blk != 0:
            # Prefer a divisor of T (multiple of 8) if it isn't much smaller; else mask.
            cand, best = t_blk, None
            while cand >= 8:
                if T % cand == 0:
                    best = cand
                    break
                cand -= 8
            if best is not None and best * 2 >= t_blk:
                t_blk = best
    ragged_t = (T % t_blk) != 0
    grid = (pl.cdiv(N, b_blk), pl.cdiv(T, t_blk))

    kernel = functools.partial(_sap_online_kernel, t_blk=t_blk, t_total=T,
                               ragged_t=ragged_t)
    return pl.pallas_call(
        kernel,
        out_shape=jax.ShapeDtypeStruct((N, H), dtype),
        grid_spec=pltpu.PrefetchScalarGridSpec(
            num_scalar_prefetch=0,
            grid=grid,
            in_specs=[
                pl.BlockSpec((b_blk, t_blk, H), lambda n, t: (n, t, 0)),
                pl.BlockSpec((1, H), lambda n, t: (0, 0)),
            ],
            out_specs=pl.BlockSpec((b_blk, H), lambda n, t: (n, 0)),
            scratch_shapes=[
                pltpu.VMEM((b_blk, 1), jnp.float32),   # running max
                pltpu.VMEM((b_blk, 1), jnp.float32),   # running softmax denominator
                pltpu.VMEM((b_blk, H), jnp.float32),   # running weighted sum
            ],
        ),
        compiler_params=pltpu.CompilerParams(
            dimension_semantics=("parallel", "arbitrary"),
            vmem_limit_bytes=vmem_limit,
        ),
        cost_estimate=cost,
    )(batch_rep, w_row)


def _reference(batch_rep, w, b):
    # Pure-JAX reference mirroring the PyTorch forward (includes the bias add).
    x = batch_rep.astype(jnp.float32)
    att_logits = jnp.squeeze(x @ w.astype(jnp.float32), -1) + b[0, 0]   # (N, T)
    att_w = jax.nn.softmax(att_logits, axis=-1)[..., None]              # (N, T, 1)
    return jnp.sum(x * att_w, axis=1).astype(batch_rep.dtype)           # (N, H)


def _check(name, N, T, H, key, max_block_bytes=None):
    kx, kw, kb = jax.random.split(key, 3)
    batch_rep = jax.random.normal(kx, (N, T, H), dtype=jnp.float32)
    bound = 1.0 / (H ** 0.5)
    w = jax.random.uniform(kw, (H, 1), dtype=jnp.float32, minval=-bound, maxval=bound)
    b = jax.random.uniform(kb, (1, 1), dtype=jnp.float32, minval=-bound, maxval=bound)
    out = jax.block_until_ready(
        self_attention_pooling(batch_rep, w, b, max_block_bytes=max_block_bytes))
    ref = _reference(batch_rep, w, b)
    assert out.shape == (N, H), name
    assert jnp.allclose(out, ref, atol=1e-5, rtol=1e-5), f"mismatch vs reference: {name}"


if __name__ == "__main__":
    keys = jax.random.split(jax.random.PRNGKey(0), 4)
    # Module-sized example (N=2, T=8, H=32): full-T path, single full-dim block.
    _check("small", 2, 8, 32, keys[0])
    # Ragged batch tiling (N not a multiple of the batch block; no jnp.pad copy).
    _check("ragged_batch", 20, 8, 32, keys[1])
    # Forced T-tiling (online-softmax path), T divisible by the T block.
    _check("t_tiled", 4, 24, 128, keys[2], max_block_bytes=16 * 1024)
    # Forced T-tiling with a ragged (masked) last T block.
    _check("t_tiled_ragged", 3, 20, 128, keys[3], max_block_bytes=12 * 1024)
    print("KERNEL_OK")
</pallas_src>

<mosaic_0001>
module attributes {stable_mosaic.version = 11 : i64} {
  func.func @_sap_kernel(%arg0: i32, %arg1: memref<2x8x32xf32, #tpu.memory_space<vmem>>, %arg2: memref<1x32xf32, #tpu.memory_space<vmem>>, %arg3: memref<2x32xf32, #tpu.memory_space<vmem>>) attributes {dimension_semantics = [#tpu.dimension_semantics<parallel>], iteration_bounds = array<i64: 1>, scalar_prefetch = 0 : i64, scratch_operands = 0 : i64, tpu.core_type = #tpu.core_type<tc>, window_params = [{transform_indices = @transform_0, window_bounds = array<i64: 2, 8, 32>}, {pipeline_mode = #tpu.pipeline_mode<synchronous>, transform_indices = @transform_1, window_bounds = array<i64: 1, 32>}, {transform_indices = @transform_2, window_bounds = array<i64: 2, 32>}]} {
    %c0 = arith.constant 0 : index
    %c0_0 = arith.constant 0 : index
    %c0_1 = arith.constant 0 : index
    %0 = vector.load %arg1[%c0, %c0_0, %c0_1] : memref<2x8x32xf32, #tpu.memory_space<vmem>>, vector<2x8x32xf32>
    %c0_2 = arith.constant 0 : index
    %c0_3 = arith.constant 0 : index
    %1 = vector.load %arg2[%c0_2, %c0_3] : memref<1x32xf32, #tpu.memory_space<vmem>>, vector<1x32xf32>
    %2 = vector.shape_cast %1 : vector<1x32xf32> to vector<1x1x32xf32>
    %3 = vector.broadcast %2 : vector<1x1x32xf32> to vector<2x8x32xf32>
    %4 = arith.mulf %0, %3 : vector<2x8x32xf32>
    %cst = arith.constant dense<0.000000e+00> : vector<2x8xf32>
    %5 = vector.multi_reduction <add>, %4, %cst [2] : vector<2x8x32xf32> to vector<2x8xf32>
    %cst_4 = arith.constant dense<0xFF800000> : vector<2xf32>
    %6 = vector.multi_reduction <maximumf>, %5, %cst_4 [1] : vector<2x8xf32> to vector<2xf32>
    %7 = vector.shape_cast %6 : vector<2xf32> to vector<2x1xf32>
    %8 = vector.broadcast %7 : vector<2x1xf32> to vector<2x8xf32>
    %9 = arith.subf %5, %8 : vector<2x8xf32>
    %10 = math.exp %9 : vector<2x8xf32>
    %cst_5 = arith.constant dense<0.000000e+00> : vector<2xf32>
    %11 = vector.multi_reduction <add>, %10, %cst_5 [1] : vector<2x8xf32> to vector<2xf32>
    %12 = vector.shape_cast %11 : vector<2xf32> to vector<2x1xf32>
    %13 = tpu.reciprocal %12 : vector<2x1xf32> -> vector<2x1xf32>
    %14 = vector.broadcast %13 : vector<2x1xf32> to vector<2x8xf32>
    %15 = arith.mulf %10, %14 : vector<2x8xf32>
    %16 = vector.shape_cast %15 : vector<2x8xf32> to vector<2x8x1xf32>
    %17 = vector.broadcast %16 : vector<2x8x1xf32> to vector<2x8x32xf32>
    %18 = arith.mulf %17, %0 : vector<2x8x32xf32>
    %cst_6 = arith.constant dense<0.000000e+00> : vector<2x32xf32>
    %19 = vector.multi_reduction <add>, %18, %cst_6 [1] : vector<2x8x32xf32> to vector<2x32xf32>
    %c0_7 = arith.constant 0 : index
    %c0_8 = arith.constant 0 : index
    %20 = vector.load %arg3[%c0_7, %c0_8] : memref<2x32xf32, #tpu.memory_space<vmem>>, vector<2x32xf32>
    tpu.vector_store %arg3[%c0_7, %c0_8], %19 {strides = array<i32>} : memref<2x32xf32, #tpu.memory_space<vmem>>, vector<2x32xf32>,
    return
  }
  func.func @transform_0(%arg0: i32) -> (i32, i32, i32) {
    %c0_i32 = arith.constant 0 : i32
    %c0_i32_0 = arith.constant 0 : i32
    %c0_i32_1 = arith.constant 0 : i32
    return %arg0, %c0_i32, %c0_i32_0 : i32, i32, i32
  }
  func.func @transform_1(%arg0: i32) -> (i32, i32) {
    %c0_i32 = arith.constant 0 : i32
    %c0_i32_0 = arith.constant 0 : i32
    %c0_i32_1 = arith.constant 0 : i32
    return %c0_i32, %c0_i32_0 : i32, i32
  }
  func.func @transform_2(%arg0: i32) -> (i32, i32) {
    %c0_i32 = arith.constant 0 : i32
    %c0_i32_0 = arith.constant 0 : i32
    return %arg0, %c0_i32 : i32, i32
  }
}

</mosaic_0001>

<bundles_post_ra>
// kernel: tpu_custom_call.1
= control target key start
LH: loop header
LB: loop body
LE: loop exit
PB: predicated region body
PF: predicated region fallthrough
CT: control target
= control target key end

     0   :  { %7 = vsyncpa [#allocation3], 0  ;;  %s280_s0 = inlined_call_operand.hbm [shape: f32[2,8,32], index: 0, kind: input, shape index: {}]   ;;  %s281_s1 = inlined_call_operand.vmem [shape: f32[1,32], index: 1, kind: input, shape index: {}]   ;;  %s282_s2 = inlined_call_operand.hbm [shape: f32[2,32], index: 2, kind: output, shape index: {}]  }
   0x1   :  { %8 = vsyncpa [#allocation4], 0  ;;  %s224_s9 = smov [#allocation2]   ;;  %s176_s13 = scalar_lea.hbm %s280_s0, 256 }
   0x2   :  { %s14_s10 = sshll.u32 %s224_s9, 4  ;;  %p177_p0 = scmp.ne.s32.totalorder %s280_s0, %s176_s13  ;;  %s15_s10 = int_to_ptr.vmem [resolvable:$true] %s14_s10 }
   0x3   :  { %p180_p1 = scmp.lt.u32.totalorder %s176_s13, %s280_s0 }
   0x5   :  { %p182_p2 = pnand %p180_p1, %p177_p0 }
   0x7   :  { %185 = shalt.err (!%p182_p2)
}
   0x8   :  { %s186_s18 = scalar_lea.vmem %s15_s10, 256  ;;  %p191_p4 = scmp.lt.s32.totalorder %s15_s10, %s15_s10 }
   0x9   :  { %p187_p3 = scmp.ne.s32.totalorder %s15_s10, %s186_s18  ;;  %p192_p5 = scmp.lt.s32.totalorder %s186_s18, %s186_s18 }
   0xb   :  { %p193_p6 = por %p192_p5, %p191_p4 }
   0xd   :  { %p194_p7 = pnand %p193_p6, %p187_p3 }
   0xf   :  { %197 = shalt.err (!%p194_p7)
}
  0x10   :  { %s225_s19 = smov 128   ;;  %s226_s20 = smov 8  }
  0x11   :  { %20 = dma.hbm_to_vmem [thread:$0]  %s280_s0, 256, %s15_s10, [#allocation3], %s225_s19, %s225_s19, %s226_s20  }
  0x12   :  { %220 = dma.done.wait [#allocation3], 256  }
  0x13   :  { %221 = vsyncadd [#allocation3], 4294967040  ;;  %v26_v0 = vld [vmem:[#allocation2] sm:$0xff]  ;;  %vm37_vm0 = vcmask 261120   ;;  %v27_v2 = vld [vmem:[#allocation2 + $0x8] sm:$0xff]  ;;  %v46_v7 = vlaneseq  ;;  %vm56_vm1 = vcmask 1041409  }
  0x14   :  { %v162_v1 = vld [vmem:[%s281_s1] ss:$0 sm:$0xff]  ;;  %vm59_vm2 = vcmask 58368   ;;  %v227_v17 = vmov 0   ;;  %s228_s0 = smov [#allocation5]   ;;  %vm145_vm3 = vcmask 254976  }
  0x15   :  { %v35_v3 = vmul.f32 %v162_v1, %v26_v0  ;;  %v36_v4 = vmul.f32 %v162_v1, %v27_v2  ;;  %v47_v8 = vand.u32 127, %v46_v7  ;;  %v49_v9 = vshrl.u32 %v46_v7, 7  ;;  %169 = vset.pattern.permute.xlu0 %v227_v17  ;;  %168 = vset.pattern.permute.xlu1 %v227_v17  ;;  %s153_s1 = sshll.u32 %s228_s0, 4  ;;  %s154_s1 = int_to_ptr.vmem [resolvable:$true] %s153_s1 }
  0x16   :  { %s198_s25 = scalar_lea.vmem %s154_s1, 32  ;;  %p203_p9 = scmp.lt.s32.totalorder %s154_s1, %s154_s1 }
  0x17   :  { %v38_v5 = vsel %vm37_vm0, %v35_v3, 0.0  ;;  %v41_v6 = vsel %vm37_vm0, %v36_v4, 0.0  ;;  %v50_v11 = vsub.s32 %v47_v8, %v49_v9  ;;  %v66_v18 = vsub.s32 0, %v49_v9  ;;  %p199_p8 = scmp.ne.s32.totalorder %s154_s1, %s198_s25  ;;  %p204_p10 = scmp.lt.s32.totalorder %s198_s25, %s198_s25 }
  0x18   :  { %39 = vadd.xlane.f32.xlu0 %v38_v5  ;;  %v70_v19 = vsub.s32 1, %v49_v9 }
  0x19   :  { %p205_p11 = por %p204_p10, %p203_p9 }
  0x1b   :  { %p206_p12 = pnand %p205_p11, %p199_p8 }
  0x1c   :  { %42 = vadd.xlane.f32.xlu0 %v41_v6 }
  0xa5   :  { %v40_v10 = vpop.xlane.xlu0 %39 }
  0xa6   :  { %v51_v13 = vrot.slane %v40_v10, %v50_v11 }
  0xa9   :  { %v43_v12 = vpop.xlane.xlu0 %42 }
  0xaa   :  { %v55_v14 = vrot.slane %v43_v12, %v50_v11 }
  0xac   :  { %v57_v15 = vsel %vm56_vm1, %v55_v14, %v51_v13 }
  0xad   :  { %v60_v16 = vsel %vm59_vm2, %v57_v15, -inf }
  0xae   :  { %61 = vmax.xlane.f32.xlu1 %v60_v16 }
 0x13b   :  { %v62_v20 = vpop.xlane.xlu1 %61 }
 0x13c   :  { %v67_v21 = vrot.slane %v62_v20, %v66_v18  ;;  %v71_v22 = vrot.slane %v62_v20, %v70_v19 }
 0x13e   :  { %v74_v23 = vsub.f32 %v40_v10, %v67_v21  ;;  %v75_v24 = vsub.f32 %v43_v12, %v71_v22 }
 0x140   :  { %v76_v25 = vmul.f32 1.442695, %v74_v23  ;;  %v78_v26 = vmul.f32 1.442695, %v75_v24 }
 0x142   :  { %170 = vpow2.f32 %v76_v25 }
 0x143   :  { %172 = vpow2.f32 %v78_v26 }
 0x14c   :  { %v171_v27 = vpop.eup %170 }
 0x14d   :  { %v173_v28 = vpop.eup %172  ;;  %83 = vperm.xlu1 %168, %v171_v27  }
 0x14e   :  { %86 = vperm.xlu0 %169, %v173_v28  }
 0x1cc   :  { %v84_v29 = vpop.permute.xlu1 %83 }
 0x1cd   :  { %v87_v30 = vpop.permute.xlu0 %86  ;;  %v91_v31 = vrot.slane %v84_v29, %v50_v11 }
 0x1ce   :  { %v95_v32 = vrot.slane %v87_v30, %v50_v11 }
 0x1d0   :  { %v96_v33 = vsel %vm56_vm1, %v95_v32, %v91_v31 }
 0x1d1   :  { %v98_v34 = vsel %vm59_vm2, %v96_v33, 0.0 }
 0x1d2   :  { %99 = vadd.xlane.f32.xlu1 %v98_v34 }
 0x25f   :  { %v100_v35 = vpop.xlane.xlu1 %99 }
 0x260   :  { %174 = vrcp.f32 %v100_v35 }
 0x26a   :  { %v175_v36 = vpop.eup %174 }
 0x26b   :  { %v106_v37 = vrot.slane %v175_v36, %v66_v18  ;;  %v110_v39 = vrot.slane %v175_v36, %v70_v19 }
 0x26d   :  { %v113_v38 = vmul.f32 %v171_v27, %v106_v37  ;;  %v114_v40 = vmul.f32 %v173_v28, %v110_v39 }
 0x26f   :  { %117 = vperm.xlu0 %169, %v113_v38  }
 0x273   :  { %122 = vperm.xlu0 %169, %v114_v40  }
 0x2ee   :  { %v118_v41 = vpop.permute.xlu0 %117 }
 0x2ef   :  { %v125_v42 = vmul.f32 %v118_v41, %v26_v0 }
 0x2f1   :  { %v127_v43 = vsel %vm37_vm0, %v125_v42, 0.0 }
 0x2f2   :  { %v128_v44 = vrot.slane %v127_v43, 4  ;;  %v123_v45 = vpop.permute.xlu0 %122 }
 0x2f3   :  { %v126_v46 = vmul.f32 %v123_v45, %v27_v2 }
 0x2f4   :  { %v129_v47 = vadd.f32 %v128_v44, %v127_v43 }
 0x2f5   :  { %v134_v48 = vsel %vm37_vm0, %v126_v46, 0.0 }
 0x2f6   :  { %v130_v49 = vrot.slane %v129_v47, 2  ;;  %v135_v50 = vrot.slane %v134_v48, 4 }
 0x2f8   :  { %v131_v51 = vadd.f32 %v130_v49, %v129_v47  ;;  %v136_v52 = vadd.f32 %v135_v50, %v134_v48 }
 0x2fa   :  { %v137_v53 = vrot.slane %v136_v52, 2  ;;  %v132_v54 = vrot.slane %v131_v51, 1 }
 0x2fc   :  { %v138_v55 = vadd.f32 %v137_v53, %v136_v52  ;;  %v133_v57 = vadd.f32 %v132_v54, %v131_v51 }
 0x2fe   :  { %v139_v56 = vrot.slane %v138_v55, 1 }
 0x300   :  { %v140_v58 = vadd.f32 %v139_v56, %v138_v55 }
 0x302   :  { %v143_v59 = vsel %vm56_vm1, %v140_v58, %v133_v57 }
 0x303   :  { %146 = vst.msk [vmem:[#allocation5] sm:$0x3] %vm145_vm3, %v143_v59 }
 0x304   :  { %209 = shalt.err (!%p206_p12)
}
 0x305   :  { %s210_s28 = scalar_lea.hbm %s282_s2, 32 }
 0x306   :  { %p211_p13 = scmp.ne.s32.totalorder %s282_s2, %s210_s28  ;;  %p214_p0 = scmp.lt.u32.totalorder %s210_s28, %s282_s2 }
 0x308   :  { %p216_p1 = pnand %p214_p0, %p211_p13 }
 0x30a   :  { %219 = shalt.err (!%p216_p1)
}
 0x30b   :  { %156 = dma.vmem_to_hbm [thread:$0]  %s154_s1, 32, %s282_s2, [#allocation4]  }
 0x30c   :  { %222 = dma.done.wait [#allocation4], 32  }
 0x30d   :  { %223 = vsyncadd [#allocation4], 4294967264 }
 0x30e   :  { %160 = vsyncpa [#allocation3], 1 }
 0x30f   :  { %161 = vsyncpa [#allocation4], 1 }

</bundles_post_ra>
